<compile_context>
chip_gen: v5e
topology: v5e:2x2
jax: 0.10.0
libtpu: 0.0.40
codegen_flags: <defaults>
</compile_context>

<pallas_src>
import jax
import jax.numpy as jnp
from jax import lax
from jax.experimental import pallas as pl
from jax.experimental.pallas import tpu as pltpu


def rnn_kernel(maxlen_ref,               # SMEM (1,) int32   -- scalar prefetch
               len_ref,                  # VMEM (tb, 1) int32
               xproj_ref,                # VMEM (TC, tb, H) f32  : x@W_ih0 + b0
               whh0_ref,                 # VMEM (H, H) f32
               w1_ref,                   # VMEM (2H, H) f32      : [W_ih1; W_hh1]
               b1_ref,                   # VMEM (1, H) f32
               wlin_ref,                 # VMEM (H, OPAD) f32
               blin_ref,                 # VMEM (1, OPAD) f32
               out_ref,                  # VMEM (tb, OPAD) f32
               h0_ref, h1_ref):          # VMEM scratch (tb, H) f32, persist over grid
    TC, tb, H = xproj_ref.shape
    t_idx = pl.program_id(1)

    # Reset hidden state at the start of every batch block's time sweep.
    @pl.when(t_idx == 0)
    def _init():
        h0_ref[...] = jnp.zeros_like(h0_ref)
        h1_ref[...] = jnp.zeros_like(h1_ref)

    chunk_start = t_idx * TC
    max_len = maxlen_ref[0]

    # Skip time chunks that lie entirely beyond the longest sequence.
    @pl.when(chunk_start < max_len)
    def _compute():
        lengths = len_ref[...]                             # (tb, 1) int32
        whh0 = whh0_ref[...]                               # (H, H) f32
        w1 = w1_ref[...]                                   # (2H, H) f32
        b1 = jnp.broadcast_to(b1_ref[...], (tb, H))        # hoisted broadcast (f32)

        def step(i, carry):
            h0, h1 = carry                                 # (tb, H) f32 each
            # layer 0: input projection hoisted -> only the recurrent matmul here
            pre0 = xproj_ref[i] + jnp.dot(h0, whh0,
                                          preferred_element_type=jnp.float32)
            h0n = jnp.tanh(pre0)
            # layer 1: fused [x;h] @ [W_ih1; W_hh1]
            cat = jnp.concatenate([h0n, h1], axis=1)       # (tb, 2H) f32
            pre1 = jnp.dot(cat, w1, preferred_element_type=jnp.float32) + b1
            h1n = jnp.tanh(pre1)
            # packed-sequence semantics: only sequences still "alive" update.
            valid = (chunk_start + i) < lengths            # (tb, 1) -> broadcast over H
            return (jnp.where(valid, h0n, h0), jnp.where(valid, h1n, h1))

        h0f, h1f = lax.fori_loop(0, TC, step, (h0_ref[...], h1_ref[...]),
                                 unroll=True)
        h0_ref[...] = h0f
        h1_ref[...] = h1f

    # Classifier head on the *layer-0* final hidden (matches h_n[0] in the PyTorch code).
    @pl.when(t_idx == pl.num_programs(1) - 1)
    def _finalize():
        logits = jnp.dot(h0_ref[...], wlin_ref[...],
                         preferred_element_type=jnp.float32) + blin_ref[...]
        out_ref[...] = jnp.maximum(logits, 0.0)            # ReLU


def recurrent_network_forward(x, emb_table, params, *, time_chunk=4, batch_block=None):
    """x: (B, T) int32 token ids. Returns (B, O) float32."""
    # --- glue in plain JAX: embedding gather + length heuristic (mirrors reference) ---
    emb_out = emb_table[x]                                              # (B, T, E) f32
    # np.count_nonzero(embedding_output, axis=1)[:, 0]  (reference semantics; a real
    # token whose feature-0 happens to be 0 would shorten the length -- same as PyTorch).
    lengths = jnp.count_nonzero(emb_out, axis=1)[:, 0].astype(jnp.int32)
    max_len = jnp.max(lengths).reshape((1,)).astype(jnp.int32)          # SMEM scalar
    lengths2d = lengths[:, None]                                        # (B, 1)

    B, T = x.shape
    H = params["whh0"].shape[0]
    O = params["wlin"].shape[1]
    OPAD = 128                                                          # lane-dense out

    # Hoist input projection + input bias out of the recurrent loop as one big
    # f32 matmul; result is time-major (T, B, H) f32.
    x_proj = jnp.einsum("bte,eh->tbh",
                        emb_out.astype(jnp.float32),
                        params["wih0"].astype(jnp.float32),
                        preferred_element_type=jnp.float32) + params["b0"]

    tb = B if batch_block is None else batch_block
    assert B % tb == 0, "batch_block must divide B"
    TC = min(time_chunk, T)
    n_chunks = pl.cdiv(T, TC)
    T_pad = n_chunks * TC
    if T_pad != T:
        x_proj = jnp.pad(x_proj, ((0, T_pad - T), (0, 0), (0, 0)))

    # Fuse layer-1's two matmuls -> single (2H, H) operand.
    w1cat = jnp.concatenate([params["wih1"], params["whh1"]], axis=0).astype(jnp.float32)
    whh0 = params["whh0"].astype(jnp.float32)
    b1 = params["b1"].astype(jnp.float32)

    # Lane-dense classifier output (pad O -> 128, slice back afterwards).
    wlin_pad = jnp.zeros((H, OPAD), jnp.float32).at[:, :O].set(params["wlin"])
    blin_pad = jnp.zeros((1, OPAD), jnp.float32).at[:, :O].set(params["blin"])

    grid = (B // tb, n_chunks)                         # (parallel batch, arbitrary time)

    out = pl.pallas_call(
        rnn_kernel,
        out_shape=jax.ShapeDtypeStruct((B, OPAD), jnp.float32),
        grid_spec=pltpu.PrefetchScalarGridSpec(
            num_scalar_prefetch=1,                     # max_len -> SMEM
            grid=grid,
            in_specs=[
                pl.BlockSpec((tb, 1),     lambda b, t, ml: (b, 0)),      # lengths
                pl.BlockSpec((TC, tb, H), lambda b, t, ml: (t, b, 0)),   # x_proj (streamed)
                pl.BlockSpec((H, H),      lambda b, t, ml: (0, 0)),      # whh0
                pl.BlockSpec((2 * H, H),  lambda b, t, ml: (0, 0)),      # [wih1; whh1]
                pl.BlockSpec((1, H),      lambda b, t, ml: (0, 0)),      # b1
                pl.BlockSpec((H, OPAD),   lambda b, t, ml: (0, 0)),      # wlin (padded)
                pl.BlockSpec((1, OPAD),   lambda b, t, ml: (0, 0)),      # blin (padded)
            ],
            out_specs=pl.BlockSpec((tb, OPAD), lambda b, t, ml: (b, 0)),
            scratch_shapes=[pltpu.VMEM((tb, H), jnp.float32),            # h0 (layer 0)
                            pltpu.VMEM((tb, H), jnp.float32)],           # h1 (layer 1)
        ),
        compiler_params=pltpu.CompilerParams(
            dimension_semantics=("parallel", "arbitrary")),
    )(max_len, lengths2d, x_proj, whh0, w1cat, b1, wlin_pad, blin_pad)

    return out[:, :O]


def reference_forward(x, emb_table, params):
    """Pure-JAX f32 reference with identical semantics (for a sanity check)."""
    emb = emb_table[x]                                                  # (B, T, E)
    lengths = jnp.count_nonzero(emb, axis=1)[:, 0].astype(jnp.int32)
    B, T, _ = emb.shape
    H = params["whh0"].shape[0]
    h0 = jnp.zeros((B, H), jnp.float32)
    h1 = jnp.zeros((B, H), jnp.float32)
    for t in range(T):
        x_t = emb[:, t, :]
        h0n = jnp.tanh(x_t @ params["wih0"] + h0 @ params["whh0"] + params["b0"])
        h1n = jnp.tanh(h0n @ params["wih1"] + h1 @ params["whh1"] + params["b1"])
        valid = (t < lengths)[:, None]
        h0 = jnp.where(valid, h0n, h0)
        h1 = jnp.where(valid, h1n, h1)
    return jnp.maximum(h0 @ params["wlin"] + params["blin"], 0.0)


def init_params(key, E, H, O):
    """Deterministic synthetic init (PyTorch-like uniform(-1/sqrt(H), 1/sqrt(H)))."""
    ks = jax.random.split(key, 10)
    s = 1.0 / jnp.sqrt(jnp.float32(H))

    def u(k, shape):
        return jax.random.uniform(k, shape, jnp.float32, -s, s)

    return dict(
        # weights stored pre-transposed so the kernel computes x @ W
        wih0=u(ks[0], (E, H)), whh0=u(ks[1], (H, H)),
        b0=u(ks[2], (1, H)) + u(ks[3], (1, H)),               # b_ih0 + b_hh0
        wih1=u(ks[4], (H, H)), whh1=u(ks[5], (H, H)),
        b1=u(ks[6], (1, H)) + u(ks[7], (1, H)),               # b_ih1 + b_hh1
        wlin=u(ks[8], (H, O)), blin=u(ks[9], (1, O)),
    )


if __name__ == "__main__":
    B, T, V, E, H, O = 2, 8, 16, 32, 128, 4

    key = jax.random.PRNGKey(0)
    k_emb, k_par, k_tok = jax.random.split(key, 3)

    # Pretrained-style embedding table; token 0 is padding with a zero vector
    # (this is what makes the count_nonzero length heuristic work).
    emb_table = jax.random.normal(k_emb, (V, E), jnp.float32)
    emb_table = emb_table.at[0].set(0.0)

    params = init_params(k_par, E, H, O)

    # Token ids: batch 0 is full length T, batch 1 is padded after 5 tokens.
    tok = jax.random.randint(k_tok, (B, T), 1, V, dtype=jnp.int32)
    x = tok.at[1, 5:].set(0)

    out = recurrent_network_forward(x, emb_table, params)
    out = jax.block_until_ready(out)
    assert out.shape == (B, O) and out.dtype == jnp.float32

    # Numerical sanity check vs. f32 reference.
    ref = jax.block_until_ready(reference_forward(x, emb_table, params))
    assert jnp.allclose(out, ref, atol=1e-3, rtol=1e-3)

    print("KERNEL_OK")
</pallas_src>

<mosaic_0001>
module attributes {stable_mosaic.version = 11 : i64} {
  func.func @rnn_kernel(%arg0: i32, %arg1: i32, %arg2: memref<1xi32, #tpu.memory_space<smem>>, %arg3: memref<2x1xi32, #tpu.memory_space<vmem>>, %arg4: memref<4x2x128xf32, #tpu.memory_space<vmem>>, %arg5: memref<128x128xf32, #tpu.memory_space<vmem>>, %arg6: memref<256x128xf32, #tpu.memory_space<vmem>>, %arg7: memref<1x128xf32, #tpu.memory_space<vmem>>, %arg8: memref<128x128xf32, #tpu.memory_space<vmem>>, %arg9: memref<1x128xf32, #tpu.memory_space<vmem>>, %arg10: memref<2x128xf32, #tpu.memory_space<vmem>>, %arg11: memref<2x128xf32, #tpu.memory_space<vmem>>, %arg12: memref<2x128xf32, #tpu.memory_space<vmem>>) attributes {dimension_semantics = [#tpu.dimension_semantics<parallel>, #tpu.dimension_semantics<arbitrary>], iteration_bounds = array<i64: 1, 2>, scalar_prefetch = 1 : i64, scratch_operands = 2 : i64, tpu.core_type = #tpu.core_type<tc>, window_params = [{transform_indices = @transform_0, window_bounds = array<i64: 2, 1>}, {transform_indices = @transform_1, window_bounds = array<i64: 4, 2, 128>}, {pipeline_mode = #tpu.pipeline_mode<synchronous>, transform_indices = @transform_2, window_bounds = array<i64: 128, 128>}, {pipeline_mode = #tpu.pipeline_mode<synchronous>, transform_indices = @transform_3, window_bounds = array<i64: 256, 128>}, {pipeline_mode = #tpu.pipeline_mode<synchronous>, transform_indices = @transform_4, window_bounds = array<i64: 1, 128>}, {pipeline_mode = #tpu.pipeline_mode<synchronous>, transform_indices = @transform_5, window_bounds = array<i64: 128, 128>}, {pipeline_mode = #tpu.pipeline_mode<synchronous>, transform_indices = @transform_6, window_bounds = array<i64: 1, 128>}, {transform_indices = @transform_7, window_bounds = array<i64: 2, 128>}]} {
    %c0_i32 = arith.constant 0 : i32
    %0 = arith.cmpi eq, %arg1, %c0_i32 : i32
    %1 = arith.extui %0 : i1 to i32
    %c0_i32_0 = arith.constant 0 : i32
    %2 = arith.cmpi ne, %1, %c0_i32_0 : i32
    scf.if %2 {
      %cst = arith.constant 0.000000e+00 : f32
      %11 = vector.broadcast %cst : f32 to vector<2x128xf32>
      %c0_3 = arith.constant 0 : index
      %c0_4 = arith.constant 0 : index
      %12 = vector.load %arg11[%c0_3, %c0_4] : memref<2x128xf32, #tpu.memory_space<vmem>>, vector<2x128xf32>
      tpu.vector_store %arg11[%c0_3, %c0_4], %11 {strides = array<i32>} : memref<2x128xf32, #tpu.memory_space<vmem>>, vector<2x128xf32>,
      %cst_5 = arith.constant 0.000000e+00 : f32
      %13 = vector.broadcast %cst_5 : f32 to vector<2x128xf32>
      %c0_6 = arith.constant 0 : index
      %c0_7 = arith.constant 0 : index
      %14 = vector.load %arg12[%c0_6, %c0_7] : memref<2x128xf32, #tpu.memory_space<vmem>>, vector<2x128xf32>
      tpu.vector_store %arg12[%c0_6, %c0_7], %13 {strides = array<i32>} : memref<2x128xf32, #tpu.memory_space<vmem>>, vector<2x128xf32>,
    } else {
    }
    %c4_i32 = arith.constant 4 : i32
    %3 = arith.muli %arg1, %c4_i32 : i32
    %c0 = arith.constant 0 : index
    %4 = memref.load %arg2[%c0] : memref<1xi32, #tpu.memory_space<smem>>
    %5 = arith.cmpi slt, %3, %4 : i32
    %6 = arith.extui %5 : i1 to i32
    %c0_i32_1 = arith.constant 0 : i32
    %7 = arith.cmpi ne, %6, %c0_i32_1 : i32
    scf.if %7 {
      %c0_3 = arith.constant 0 : index
      %c0_4 = arith.constant 0 : index
      %11 = vector.load %arg3[%c0_3, %c0_4] : memref<2x1xi32, #tpu.memory_space<vmem>>, vector<2x1xi32>
      %c0_5 = arith.constant 0 : index
      %c0_6 = arith.constant 0 : index
      %12 = vector.load %arg5[%c0_5, %c0_6] : memref<128x128xf32, #tpu.memory_space<vmem>>, vector<128x128xf32>
      %c0_7 = arith.constant 0 : index
      %c0_8 = arith.constant 0 : index
      %13 = vector.load %arg6[%c0_7, %c0_8] : memref<256x128xf32, #tpu.memory_space<vmem>>, vector<256x128xf32>
      %c0_9 = arith.constant 0 : index
      %c0_10 = arith.constant 0 : index
      %14 = vector.load %arg7[%c0_9, %c0_10] : memref<1x128xf32, #tpu.memory_space<vmem>>, vector<1x128xf32>
      %15 = vector.shape_cast %14 : vector<1x128xf32> to vector<1x128xf32>
      %16 = vector.broadcast %15 : vector<1x128xf32> to vector<2x128xf32>
      %c0_11 = arith.constant 0 : index
      %c0_12 = arith.constant 0 : index
      %17 = vector.load %arg11[%c0_11, %c0_12] : memref<2x128xf32, #tpu.memory_space<vmem>>, vector<2x128xf32>
      %c0_13 = arith.constant 0 : index
      %c0_14 = arith.constant 0 : index
      %18 = vector.load %arg12[%c0_13, %c0_14] : memref<2x128xf32, #tpu.memory_space<vmem>>, vector<2x128xf32>
      %c0_i32_15 = arith.constant 0 : i32
      %19 = arith.index_cast %c0_i32_15 : i32 to index
      %c0_16 = arith.constant 0 : index
      %c0_17 = arith.constant 0 : index
      %20 = vector.load %arg4[%19, %c0_16, %c0_17] : memref<4x2x128xf32, #tpu.memory_space<vmem>>, vector<1x2x128xf32>
      %21 = vector.shape_cast %20 : vector<1x2x128xf32> to vector<2x128xf32>
      %cst = arith.constant dense<0.000000e+00> : vector<2x128xf32>
      %22 = tpu.matmul %17, %12, %cst {dimension_numbers = #tpu.dot_dimension_numbers<[1], [0], [0], [1], [0, 0, 1, 1], [], []>} : vector<2x128xf32>, vector<128x128xf32>, vector<2x128xf32> -> vector<2x128xf32>
      %23 = arith.addf %21, %22 : vector<2x128xf32>
      %24 = math.tanh %23 : vector<2x128xf32>
      %25 = tpu.concatenate %24, %18 in 1 : vector<2x128xf32>, vector<2x128xf32> -> vector<2x256xf32>
      %cst_18 = arith.constant dense<0.000000e+00> : vector<2x128xf32>
      %26 = tpu.matmul %25, %13, %cst_18 {dimension_numbers = #tpu.dot_dimension_numbers<[1], [0], [0], [1], [0, 0, 1, 1], [], []>} : vector<2x256xf32>, vector<256x128xf32>, vector<2x128xf32> -> vector<2x128xf32>
      %27 = arith.addf %26, %16 : vector<2x128xf32>
      %28 = math.tanh %27 : vector<2x128xf32>
      %29 = arith.addi %3, %c0_i32_15 : i32
      %30 = vector.broadcast %29 : i32 to vector<2x1xi32>
      %31 = arith.cmpi slt, %30, %11 : vector<2x1xi32>
      %32 = vector.shape_cast %31 : vector<2x1xi1> to vector<2x1xi1>
      %33 = vector.broadcast %32 : vector<2x1xi1> to vector<2x128xi1>
      %34 = arith.select %33, %24, %17 : vector<2x128xi1>, vector<2x128xf32>
      %35 = vector.shape_cast %31 : vector<2x1xi1> to vector<2x1xi1>
      %36 = vector.broadcast %35 : vector<2x1xi1> to vector<2x128xi1>
      %37 = arith.select %36, %28, %18 : vector<2x128xi1>, vector<2x128xf32>
      %c1_i32_19 = arith.constant 1 : i32
      %38 = arith.index_cast %c1_i32_19 : i32 to index
      %c0_20 = arith.constant 0 : index
      %c0_21 = arith.constant 0 : index
      %39 = vector.load %arg4[%38, %c0_20, %c0_21] : memref<4x2x128xf32, #tpu.memory_space<vmem>>, vector<1x2x128xf32>
      %40 = vector.shape_cast %39 : vector<1x2x128xf32> to vector<2x128xf32>
      %cst_22 = arith.constant dense<0.000000e+00> : vector<2x128xf32>
      %41 = tpu.matmul %34, %12, %cst_22 {dimension_numbers = #tpu.dot_dimension_numbers<[1], [0], [0], [1], [0, 0, 1, 1], [], []>} : vector<2x128xf32>, vector<128x128xf32>, vector<2x128xf32> -> vector<2x128xf32>
      %42 = arith.addf %40, %41 : vector<2x128xf32>
      %43 = math.tanh %42 : vector<2x128xf32>
      %44 = tpu.concatenate %43, %37 in 1 : vector<2x128xf32>, vector<2x128xf32> -> vector<2x256xf32>
      %cst_23 = arith.constant dense<0.000000e+00> : vector<2x128xf32>
      %45 = tpu.matmul %44, %13, %cst_23 {dimension_numbers = #tpu.dot_dimension_numbers<[1], [0], [0], [1], [0, 0, 1, 1], [], []>} : vector<2x256xf32>, vector<256x128xf32>, vector<2x128xf32> -> vector<2x128xf32>
      %46 = arith.addf %45, %16 : vector<2x128xf32>
      %47 = math.tanh %46 : vector<2x128xf32>
      %48 = arith.addi %3, %c1_i32_19 : i32
      %49 = vector.broadcast %48 : i32 to vector<2x1xi32>
      %50 = arith.cmpi slt, %49, %11 : vector<2x1xi32>
      %51 = vector.shape_cast %50 : vector<2x1xi1> to vector<2x1xi1>
      %52 = vector.broadcast %51 : vector<2x1xi1> to vector<2x128xi1>
      %53 = arith.select %52, %43, %34 : vector<2x128xi1>, vector<2x128xf32>
      %54 = vector.shape_cast %50 : vector<2x1xi1> to vector<2x1xi1>
      %55 = vector.broadcast %54 : vector<2x1xi1> to vector<2x128xi1>
      %56 = arith.select %55, %47, %37 : vector<2x128xi1>, vector<2x128xf32>
      %c2_i32 = arith.constant 2 : i32
      %57 = arith.index_cast %c2_i32 : i32 to index
      %c0_24 = arith.constant 0 : index
      %c0_25 = arith.constant 0 : index
      %58 = vector.load %arg4[%57, %c0_24, %c0_25] : memref<4x2x128xf32, #tpu.memory_space<vmem>>, vector<1x2x128xf32>
      %59 = vector.shape_cast %58 : vector<1x2x128xf32> to vector<2x128xf32>
      %cst_26 = arith.constant dense<0.000000e+00> : vector<2x128xf32>
      %60 = tpu.matmul %53, %12, %cst_26 {dimension_numbers = #tpu.dot_dimension_numbers<[1], [0], [0], [1], [0, 0, 1, 1], [], []>} : vector<2x128xf32>, vector<128x128xf32>, vector<2x128xf32> -> vector<2x128xf32>
      %61 = arith.addf %59, %60 : vector<2x128xf32>
      %62 = math.tanh %61 : vector<2x128xf32>
      %63 = tpu.concatenate %62, %56 in 1 : vector<2x128xf32>, vector<2x128xf32> -> vector<2x256xf32>
      %cst_27 = arith.constant dense<0.000000e+00> : vector<2x128xf32>
      %64 = tpu.matmul %63, %13, %cst_27 {dimension_numbers = #tpu.dot_dimension_numbers<[1], [0], [0], [1], [0, 0, 1, 1], [], []>} : vector<2x256xf32>, vector<256x128xf32>, vector<2x128xf32> -> vector<2x128xf32>
      %65 = arith.addf %64, %16 : vector<2x128xf32>
      %66 = math.tanh %65 : vector<2x128xf32>
      %67 = arith.addi %3, %c2_i32 : i32
      %68 = vector.broadcast %67 : i32 to vector<2x1xi32>
      %69 = arith.cmpi slt, %68, %11 : vector<2x1xi32>
      %70 = vector.shape_cast %69 : vector<2x1xi1> to vector<2x1xi1>
      %71 = vector.broadcast %70 : vector<2x1xi1> to vector<2x128xi1>
      %72 = arith.select %71, %62, %53 : vector<2x128xi1>, vector<2x128xf32>
      %73 = vector.shape_cast %69 : vector<2x1xi1> to vector<2x1xi1>
      %74 = vector.broadcast %73 : vector<2x1xi1> to vector<2x128xi1>
      %75 = arith.select %74, %66, %56 : vector<2x128xi1>, vector<2x128xf32>
      %c3_i32 = arith.constant 3 : i32
      %76 = arith.index_cast %c3_i32 : i32 to index
      %c0_28 = arith.constant 0 : index
      %c0_29 = arith.constant 0 : index
      %77 = vector.load %arg4[%76, %c0_28, %c0_29] : memref<4x2x128xf32, #tpu.memory_space<vmem>>, vector<1x2x128xf32>
      %78 = vector.shape_cast %77 : vector<1x2x128xf32> to vector<2x128xf32>
      %cst_30 = arith.constant dense<0.000000e+00> : vector<2x128xf32>
      %79 = tpu.matmul %72, %12, %cst_30 {dimension_numbers = #tpu.dot_dimension_numbers<[1], [0], [0], [1], [0, 0, 1, 1], [], []>} : vector<2x128xf32>, vector<128x128xf32>, vector<2x128xf32> -> vector<2x128xf32>
      %80 = arith.addf %78, %79 : vector<2x128xf32>
      %81 = math.tanh %80 : vector<2x128xf32>
      %82 = tpu.concatenate %81, %75 in 1 : vector<2x128xf32>, vector<2x128xf32> -> vector<2x256xf32>
      %cst_31 = arith.constant dense<0.000000e+00> : vector<2x128xf32>
      %83 = tpu.matmul %82, %13, %cst_31 {dimension_numbers = #tpu.dot_dimension_numbers<[1], [0], [0], [1], [0, 0, 1, 1], [], []>} : vector<2x256xf32>, vector<256x128xf32>, vector<2x128xf32> -> vector<2x128xf32>
      %84 = arith.addf %83, %16 : vector<2x128xf32>
      %85 = math.tanh %84 : vector<2x128xf32>
      %86 = arith.addi %3, %c3_i32 : i32
      %87 = vector.broadcast %86 : i32 to vector<2x1xi32>
      %88 = arith.cmpi slt, %87, %11 : vector<2x1xi32>
      %89 = vector.shape_cast %88 : vector<2x1xi1> to vector<2x1xi1>
      %90 = vector.broadcast %89 : vector<2x1xi1> to vector<2x128xi1>
      %91 = arith.select %90, %81, %72 : vector<2x128xi1>, vector<2x128xf32>
      %92 = vector.shape_cast %88 : vector<2x1xi1> to vector<2x1xi1>
      %93 = vector.broadcast %92 : vector<2x1xi1> to vector<2x128xi1>
      %94 = arith.select %93, %85, %75 : vector<2x128xi1>, vector<2x128xf32>
      %c4_i32_32 = arith.constant 4 : i32
      %c0_33 = arith.constant 0 : index
      %c0_34 = arith.constant 0 : index
      %95 = vector.load %arg11[%c0_33, %c0_34] : memref<2x128xf32, #tpu.memory_space<vmem>>, vector<2x128xf32>
      tpu.vector_store %arg11[%c0_33, %c0_34], %91 {strides = array<i32>} : memref<2x128xf32, #tpu.memory_space<vmem>>, vector<2x128xf32>,
      %c0_35 = arith.constant 0 : index
      %c0_36 = arith.constant 0 : index
      %96 = vector.load %arg12[%c0_35, %c0_36] : memref<2x128xf32, #tpu.memory_space<vmem>>, vector<2x128xf32>
      tpu.vector_store %arg12[%c0_35, %c0_36], %94 {strides = array<i32>} : memref<2x128xf32, #tpu.memory_space<vmem>>, vector<2x128xf32>,
    } else {
    }
    %c1_i32 = arith.constant 1 : i32
    %8 = arith.cmpi eq, %arg1, %c1_i32 : i32
    %9 = arith.extui %8 : i1 to i32
    %c0_i32_2 = arith.constant 0 : i32
    %10 = arith.cmpi ne, %9, %c0_i32_2 : i32
    scf.if %10 {
      %c0_3 = arith.constant 0 : index
      %c0_4 = arith.constant 0 : index
      %11 = vector.load %arg11[%c0_3, %c0_4] : memref<2x128xf32, #tpu.memory_space<vmem>>, vector<2x128xf32>
      %c0_5 = arith.constant 0 : index
      %c0_6 = arith.constant 0 : index
      %12 = vector.load %arg8[%c0_5, %c0_6] : memref<128x128xf32, #tpu.memory_space<vmem>>, vector<128x128xf32>
      %cst = arith.constant dense<0.000000e+00> : vector<2x128xf32>
      %13 = tpu.matmul %11, %12, %cst {dimension_numbers = #tpu.dot_dimension_numbers<[1], [0], [0], [1], [0, 0, 1, 1], [], []>} : vector<2x128xf32>, vector<128x128xf32>, vector<2x128xf32> -> vector<2x128xf32>
      %c0_7 = arith.constant 0 : index
      %c0_8 = arith.constant 0 : index
      %14 = vector.load %arg9[%c0_7, %c0_8] : memref<1x128xf32, #tpu.memory_space<vmem>>, vector<1x128xf32>
      %15 = vector.broadcast %14 : vector<1x128xf32> to vector<2x128xf32>
      %16 = arith.addf %13, %15 : vector<2x128xf32>
      %cst_9 = arith.constant 0.000000e+00 : f32
      %17 = vector.broadcast %cst_9 : f32 to vector<2x128xf32>
      %18 = arith.maximumf %16, %17 : vector<2x128xf32>
      %c0_10 = arith.constant 0 : index
      %c0_11 = arith.constant 0 : index
      %19 = vector.load %arg10[%c0_10, %c0_11] : memref<2x128xf32, #tpu.memory_space<vmem>>, vector<2x128xf32>
      tpu.vector_store %arg10[%c0_10, %c0_11], %18 {strides = array<i32>} : memref<2x128xf32, #tpu.memory_space<vmem>>, vector<2x128xf32>,
    } else {
    }
    return
  }
  func.func @transform_0(%arg0: i32, %arg1: i32, %arg2: memref<1xi32, #tpu.memory_space<smem>>) -> (i32, i32) {
    %c0_i32 = arith.constant 0 : i32
    %c0_i32_0 = arith.constant 0 : i32
    return %arg0, %c0_i32 : i32, i32
  }
  func.func @transform_1(%arg0: i32, %arg1: i32, %arg2: memref<1xi32, #tpu.memory_space<smem>>) -> (i32, i32, i32) {
    %c0_i32 = arith.constant 0 : i32
    %c0_i32_0 = arith.constant 0 : i32
    return %arg1, %arg0, %c0_i32 : i32, i32, i32
  }
  func.func @transform_2(%arg0: i32, %arg1: i32, %arg2: memref<1xi32, #tpu.memory_space<smem>>) -> (i32, i32) {
    %c0_i32 = arith.constant 0 : i32
    %c0_i32_0 = arith.constant 0 : i32
    %c0_i32_1 = arith.constant 0 : i32
    return %c0_i32, %c0_i32_0 : i32, i32
  }
  func.func @transform_3(%arg0: i32, %arg1: i32, %arg2: memref<1xi32, #tpu.memory_space<smem>>) -> (i32, i32) {
    %c0_i32 = arith.constant 0 : i32
    %c0_i32_0 = arith.constant 0 : i32
    %c0_i32_1 = arith.constant 0 : i32
    return %c0_i32, %c0_i32_0 : i32, i32
  }
  func.func @transform_4(%arg0: i32, %arg1: i32, %arg2: memref<1xi32, #tpu.memory_space<smem>>) -> (i32, i32) {
    %c0_i32 = arith.constant 0 : i32
    %c0_i32_0 = arith.constant 0 : i32
    %c0_i32_1 = arith.constant 0 : i32
    return %c0_i32, %c0_i32_0 : i32, i32
  }
  func.func @transform_5(%arg0: i32, %arg1: i32, %arg2: memref<1xi32, #tpu.memory_space<smem>>) -> (i32, i32) {
    %c0_i32 = arith.constant 0 : i32
    %c0_i32_0 = arith.constant 0 : i32
    %c0_i32_1 = arith.constant 0 : i32
    return %c0_i32, %c0_i32_0 : i32, i32
  }
  func.func @transform_6(%arg0: i32, %arg1: i32, %arg2: memref<1xi32, #tpu.memory_space<smem>>) -> (i32, i32) {
    %c0_i32 = arith.constant 0 : i32
    %c0_i32_0 = arith.constant 0 : i32
    %c0_i32_1 = arith.constant 0 : i32
    return %c0_i32, %c0_i32_0 : i32, i32
  }
  func.func @transform_7(%arg0: i32, %arg1: i32, %arg2: memref<1xi32, #tpu.memory_space<smem>>) -> (i32, i32) {
    %c0_i32 = arith.constant 0 : i32
    %c0_i32_0 = arith.constant 0 : i32
    return %arg0, %c0_i32 : i32, i32
  }
}

</mosaic_0001>

<bundles_post_ra>
// kernel: tpu_custom_call.1
= control target key start
LH: loop header
LB: loop body
LE: loop exit
PB: predicated region body
PF: predicated region fallthrough
CT: control target
= control target key end

     0   :  { %s1806_s0 = inlined_call_operand.<no memory space> [shape: s32[1], index: 0, kind: input, shape index: {}]   ;;  %s1807_s1 = inlined_call_operand.vmem [shape: s32[2,1], index: 1, kind: input, shape index: {}]   ;;  %s1808_s2 = inlined_call_operand.hbm [shape: f32[8,2,128], index: 2, kind: input, shape index: {}]   ;;  %s1809_s3 = inlined_call_operand.hbm [shape: f32[128,128], index: 3, kind: input, shape index: {}]   ;;  %s1810_s4 = inlined_call_operand.hbm [shape: f32[256,128], index: 4, kind: input, shape index: {}]   ;;  %s1811_s5 = inlined_call_operand.vmem [shape: f32[1,128], index: 5, kind: input, shape index: {}]   ;;  %s1812_s6 = inlined_call_operand.hbm [shape: f32[128,128], index: 6, kind: input, shape index: {}]   ;;  %s1813_s7 = inlined_call_operand.vmem [shape: f32[1,128], index: 7, kind: input, shape index: {}]   ;;  %s1814_s8 = inlined_call_operand.hbm [shape: f32[2,128], index: 8, kind: output, shape index: {}]  }
   0x1   :  { %1816 = sst [smem:[#allocation19_spill]] %s1809_s3 }
   0x2   :  { %1817 = sst [smem:[#allocation20_spill]] %s1810_s4 }
   0x3   :  { %13 = sst [smem:[#allocation5]] %s1806_s0 }
   0x4   :  { %14 = vsyncpa [#allocation7], 0 }
   0x5   :  { %16 = vsyncpa [#allocation7 + $0x1], 0 }
   0x6   :  { %17 = vsyncpa [#allocation10], 0 }
   0x7   :  { %18 = vsyncpa [#allocation13], 0 }
   0x8   :  { %19 = vsyncpa [#allocation8], 0  ;;  %s1325_s29 = smov 0   ;;  %s1327_s30 = smov 0  }
   0x9   :  { %s1329_s9 = smov 0   ;;  %s1331_s10 = smov 0  }
   0xa   :  { %s1333_s11 = smov 0   ;;  %s1335_s12 = smov 0  }
   0xb LB: > { %s1815_s0 = sadd.s32 4294967295, %s1265_s12   ;;  %p85_p0 = scmp.ne.s32.totalorder %s1249_s30, %s1245_s29  ;;  %s1265_s12 = sphi %s1335_s12, %s25_s12   ;;  %s1261_s11 = sphi %s1333_s11, %s1830_s11   ;;  %s1257_s10 = sphi %s1331_s10, %s1829_s10   ;;  %s1253_s9 = sphi %s1329_s9, %s1828_s9   ;;  %s1249_s30 = sphi %s1327_s30, %s1827_s30   ;;  %s1245_s29 = sphi %s1325_s29, %s1826_s29  }
   0xc   : > { %p1357_p1 = scmp.eq.s32.totalorder %s1815_s0, 0  ;;  %p910_p2 = scmp.ge.s32.totalorder %s1265_s12, 1 }
   0xd   : > { %p227_p3 = scmp.lt.s32.totalorder %s1265_s12, 3  ;;  %s1820_s3 = sld [smem:[#allocation19_spill]] }
   0xe   : > { %p1365_p4 = por %p1357_p1, %p85_p0  ;;  %s1267_s19 = smov [#allocation9]  }
   0xf   : > { %p1372_p5 = pnand %p910_p2, %p227_p3  ;;  %s247_s20 = sshll.u32 %s1267_s19, 4  ;;  %s248_s20 = int_to_ptr.vmem [resolvable:$true] %s247_s20 }
  0x10   : > { %s1823_s4 = sld [smem:[#allocation20_spill]]  ;;  %s1268_s25 = smov 128  }
  0x11   : > { %p954_p6 = pneg %p1372_p5  ;;  %s1269_s26 = smov 8  }
  0x12   : > { %s1270_s27 = smov [#allocation11]   ;;  %s276_s16 = sshll.u32 %s1812_s6, 4  ;;  %s277_s16 = int_to_ptr.hbm [resolvable:$true] %s276_s16 }
  0x13   : > { %s245_s17 = sshll.u32 %s1820_s3, 4  ;;  %p1380_p7 = pnand %p954_p6, %p1357_p1  ;;  %s246_s17 = int_to_ptr.hbm [resolvable:$true] %s245_s17 }
  0x14   : > { %s261_s28 = sshll.u32 %s1270_s27, 4  ;;  %s1271_s19 = smov [#allocation12]   ;;  %s262_s28 = int_to_ptr.vmem [resolvable:$true] %s261_s28 }
  0x15   : > { %957 = dma.hbm_to_vmem [thread:$0]  (!%p1380_p7), %s246_s17, 2048, %s248_s20, [#allocation10], %s1268_s25, %s1268_s25, %s1269_s26  }
  0x16   : > { %s259_s24 = sshll.u32 %s1823_s4, 4  ;;  %s278_s22 = sshll.u32 %s1271_s19, 4  ;;  %s260_s24 = int_to_ptr.hbm [resolvable:$true] %s259_s24  ;;  %s279_s22 = int_to_ptr.vmem [resolvable:$true] %s278_s22 }
  0x17   : > { %960 = dma.hbm_to_vmem [thread:$0]  (!%p1380_p7), %s260_s24, 4096, %s262_s28, [#allocation10], %s1268_s25, %s1268_s25, %s1269_s26  }
  0x18   : > { %963 = dma.hbm_to_vmem [thread:$0]  (!%p1380_p7), %s277_s16, 2048, %s279_s22, [#allocation13], %s1268_s25, %s1268_s25, %s1269_s26  }
  0x19   : > { %s34_s17 = sadd.s32 1, %s1261_s11  ;;  %s72_s20 = sadd.s32 1, %s1253_s9 }
  0x1a   : > { %p35_p8 = scmp.ge.s32.totalorder %s34_s17, 2  ;;  %p79_p9 = scmp.ne.s32.totalorder %s1253_s9, %s1249_s30 }
  0x1b   : > { %p80_p10 = scmp.eq.s32.totalorder %s1265_s12, 0  ;;  %p971_p12 = scmp.lt.s32.totalorder %s1265_s12, 2 }
  0x1c   : > { %s1832_s17 = smov (%p35_p8, %s34_s17), 0  ;;  %s295_s27 = sand.u32 1, %s1253_s9  }
  0x1d   : > { %p1403_p11 = por %p80_p10, %p79_p9  ;;  %s67_s24 = ssub.s32 %s1261_s11, %s1832_s17 }
  0x1e   : > { %p70_p13 = scmp.eq.s32.totalorder %s67_s24, 0  ;;  %s916_s21 = sshll.u32 %s295_s27, 3 }
  0x1f   : > { %s935_s25 = sshll.u32 %s1261_s11, 3  ;;  %s299_s19 = scalar_lea.vmem [#allocation6], %s916_s21 }
  0x20   : > { %s1413_s26 = scalar_select %p70_p13, %s1253_s9, %s72_s20  }
  0x21   : > { %s305_s15 = scalar_lea.hbm %s1808_s2, %s935_s25  ;;  %s308_s22 = sshll.u32 %s299_s19, 4  ;;  %s309_s22 = int_to_ptr.vmem [resolvable:$true] %s308_s22 }
  0x22   : > { %s306_s16 = sshll.u32 %s305_s15, 4  ;;  %p965_p0 = pnand %p971_p12, %p1403_p11  ;;  %s307_s16 = int_to_ptr.hbm [resolvable:$true] %s306_s16 }
  0x23   : > { %s296_s0 = scalar_lea.sflag [#allocation7], %s295_s27  ;;  %s1272_s3 = smov 32  }
  0x24   : > { %s1273_s4 = smov 2   ;;  %320 = sbr.rel (%p1372_p5) target bundleno = 983 (0x3d7), region = 48 }
  0x25   : > { %967 = dma.hbm_to_vmem [thread:$0]  (!%p965_p0), %s307_s16, 128, %s309_s22, %s296_s0, %s1272_s3, %s1272_s3, %s1273_s4  }
  0x26   : > { %s322_s20 = sand.u32 (!%p1372_p5), 1, %s1249_s30  }
  0x27   : > { %s920_s24 = sshll.u32 (!%p1372_p5), %s322_s20, 3  ;;  %s323_s25 = scalar_lea.sflag (!%p1372_p5), [#allocation7], %s322_s20 }
  0x28   : > { %s1425_s28 = scalar_lea.vmem (!%p1372_p5), [#allocation6], %s920_s24 }
  0x29   : > { %1228 = dma.done.wait (%p1365_p4), %s323_s25, 128  }
  0x2a   : > { %1230 = vsyncadd (%p1365_p4), %s323_s25, 4294967168 }
  0x2b   : > { %1232 = dma.done.wait (%p1357_p1), [#allocation10], 6144  }
  0x2c   : > { %1234 = vsyncadd (%p1357_p1), [#allocation10], 4294961152 }
  0x2d   : > { %1236 = dma.done.wait (%p1357_p1), [#allocation13], 2048  }
  0x2e   : > { %1238 = vsyncadd (%p1357_p1), [#allocation13], 4294965248  ;;  %p924_p2 = scmp.ne.s32.totalorder %s1257_s10, 0 }
  0x30   : > { %380 = sbr.rel (%p924_p2) target bundleno = 56 (0x38), region = 68 }
  0x35   : > { %v1274_v0 = vmov 0.0  }
  0x36   : > { %381 = vst [vmem:[#allocation2] sm:$0x3] %v1274_v0 }
  0x37   : > { %382 = vst [vmem:[#allocation3] sm:$0x3] %v1274_v0 }
  0x38 PF: > { %s1441_s3 = sshll.u32 %s1257_s10, 2  ;;  %s384_s4 = sld [smem:[#allocation5]] }
  0x3e   : > { %p926_p3 = scmp.ge.s32.totalorder %s1441_s3, %s384_s4 }
  0x3f   : > { %s582_s0 = sadd.s32 (!%p926_p3), 1, %s1441_s3  ;;  %s657_s18 = sadd.s32 (!%p926_p3), 2, %s1441_s3 }
  0x40   : > { %388 = sbr.rel (%p926_p3) target bundleno = 807 (0x327), region = 72  ;;  %s732_s23 = sadd.s32 (!%p926_p3), 3, %s1441_s3 }
  0x45   : > { %v1444_v1 = vld [vmem:[#allocation9 + $0x78] sm:$0xff]  ;;  %v1446_v2 = vld [vmem:[#allocation9 + $0x70] sm:$0xff]  ;;  %v1275_v3 = vmov 0   ;;  %v1450_v4 = vld [vmem:[#allocation9 + $0x68] sm:$0xff]  ;;  %v508_v5 = vstv %s1441_s3  ;;  %v583_v13 = vstv %s582_s0  ;;  %v658_v63 = vstv %s657_s18 }
  0x46   : > { %445 = vmatpush.msra.mxu0 %v1444_v1  ;;  %1035 = vset.pattern.permute.xlu0 %v1275_v3  ;;  %v1456_v6 = vld [vmem:[#allocation9 + $0x60] sm:$0xff]  ;;  %v1461_v7 = vld [vmem:[#allocation9 + $0x58] sm:$0xff]  ;;  %v1466_v8 = vld [vmem:[%s1807_s1] sm:$0x3] }
  0x47   : > { %519 = vmatpush.msra.mxu3 %v1444_v1  ;;  %1036 = vset.pattern.permute.xlu1 %v1275_v3  ;;  %vm509_vm0 = vcmp.lt.s32.totalorder %v508_v5, %v1466_v8  ;;  %v1469_v9 = vld [vmem:[#allocation11 + $0xf8] sm:$0xff]  ;;  %v1471_v10 = vld [vmem:[#allocation11 + $0xf0] sm:$0xff]  ;;  %v1484_v16 = vld [vmem:[#allocation11 + $0xe8] sm:$0xff]  ;;  %vm584_vm1 = vcmp.lt.s32.totalorder %v583_v13, %v1466_v8  ;;  %vm659_vm3 = vcmp.lt.s32.totalorder %v658_v63, %v1466_v8 }
  0x48   : > { %446 = vmatpush.msra.mxu0 %v1446_v2  ;;  %v1473_v11 = vld [vmem:[#allocation11 + $0x78] sm:$0xff]  ;;  %v510_v12 = vsel %vm509_vm0, 1, %v1275_v3  ;;  %487 = vmatpush.msra.mxu2 %v1469_v9  ;;  %v1479_v14 = vld [vmem:[#allocation11 + $0x70] sm:$0xff]  ;;  %v1488_v17 = vld [vmem:[#allocation11 + $0x68] sm:$0xff]  ;;  %v585_v23 = vsel %vm584_vm1, 1, %v1275_v3  ;;  %v660_v0 = vsel %vm659_vm3, 1, %v1275_v3 }
  0x49   : > { %520 = vmatpush.msra.mxu3 %v1446_v2  ;;  %v1481_v15 = vld [vmem:[#allocation9 + $0x50] sm:$0xff]  ;;  %512 = vperm.xlu0 %1035, %v510_v12   ;;  %v1490_v18 = vld [vmem:[#allocation9 + $0x48] sm:$0xff]  ;;  %v1494_v19 = vld [vmem:[#allocation11 + $0xe0] sm:$0xff] }
  0x4a   : > { %447 = vmatpush.msra.mxu0 %v1450_v4  ;;  %467 = vmatpush.msra.mxu1 %v1473_v11  ;;  %v1499_v20 = vld [vmem:[#allocation11 + $0x60] sm:$0xff]  ;;  %v1504_v22 = vld [vmem:[#allocation11 + $0xd8] sm:$0xff]  ;;  %v1515_v26 = vld [vmem:[#allocation11 + $0xd0] sm:$0xff] }
  0x4b   : > { %521 = vmatpush.msra.mxu3 %v1450_v4  ;;  %488 = vmatpush.msra.mxu2 %v1471_v10  ;;  %v1501_v21 = vld [vmem:[#allocation9 + $0x40] sm:$0xff]  ;;  %v1510_v24 = vld [vmem:[#allocation11 + $0x58] sm:$0xff]  ;;  %v1520_v27 = vld [vmem:[#allocation11 + $0x50] sm:$0xff] }
  0x4c   : > { %448 = vmatpush.msra.mxu0 %v1456_v6  ;;  %468 = vmatpush.msra.mxu1 %v1479_v14  ;;  %v1512_v25 = vld [vmem:[#allocation9 + $0x38] sm:$0xff]  ;;  %v1522_v28 = vld [vmem:[#allocation9 + $0x30] sm:$0xff]  ;;  %v1525_v29 = vld [vmem:[#allocation11 + $0xc8] sm:$0xff] }
  0x4d   : > { %522 = vmatpush.msra.mxu3 %v1456_v6  ;;  %489 = vmatpush.msra.mxu2 %v1484_v16  ;;  %v1529_v30 = vld [vmem:[#allocation11 + $0x48] sm:$0xff]  ;;  %v1534_v32 = vld [vmem:[#allocation11 + $0xc0] sm:$0xff]  ;;  %v1544_v35 = vld [vmem:[#allocation11 + $0xb8] sm:$0xff] }
  0x4e   : > { %449 = vmatpush.msra.mxu0 %v1461_v7  ;;  %469 = vmatpush.msra.mxu1 %v1488_v17  ;;  %v1531_v31 = vld [vmem:[#allocation9 + $0x28] sm:$0xff]  ;;  %v1539_v33 = vld [vmem:[#allocation11 + $0x40] sm:$0xff]  ;;  %v1549_v36 = vld [vmem:[#allocation11 + $0x38] sm:$0xff] }
  0x4f   : > { %523 = vmatpush.msra.mxu3 %v1461_v7  ;;  %490 = vmatpush.msra.mxu2 %v1494_v19  ;;  %v1541_v34 = vld [vmem:[#allocation9 + $0x20] sm:$0xff]  ;;  %v1551_v37 = vld [vmem:[#allocation9 + $0x18] sm:$0xff]  ;;  %v1554_v38 = vld [vmem:[#allocation11 + $0xb0] sm:$0xff] }
  0x50   : > { %450 = vmatpush.msra.mxu0 %v1481_v15  ;;  %470 = vmatpush.msra.mxu1 %v1499_v20  ;;  %v1559_v39 = vld [vmem:[#allocation11 + $0x30] sm:$0xff]  ;;  %v1564_v41 = vld [vmem:[#allocation11 + $0xa8] sm:$0xff]  ;;  %v1574_v44 = vld [vmem:[#allocation11 + $0xa0] sm:$0xff] }
  0x51   : > { %524 = vmatpush.msra.mxu3 %v1481_v15  ;;  %491 = vmatpush.msra.mxu2 %v1504_v22  ;;  %v1561_v40 = vld [vmem:[#allocation9 + $0x10] sm:$0xff]  ;;  %v1569_v42 = vld [vmem:[#allocation11 + $0x28] sm:$0xff]  ;;  %v1579_v45 = vld [vmem:[#allocation9] sm:$0xff] }
  0x52   : > { %451 = vmatpush.msra.mxu0 %v1490_v18  ;;  %587 = vperm.xlu0 %1035, %v585_v23   ;;  %v1571_v43 = vld [vmem:[#allocation9 + $0x8] sm:$0xff]  ;;  %v1582_v46 = vld [vmem:[#allocation11 + $0x98] sm:$0xff]  ;;  %v1618_v48 = vld [vmem:[#allocation11 + $0x20] sm:$0xff] }
  0x53   : > { %471 = vmatpush.msra.mxu1 %v1510_v24  ;;  %492 = vmatpush.msra.mxu2 %v1515_v26  ;;  %v1586_v47 = vld [vmem:[#allocation2] sm:$0x3]  ;;  %v1620_v49 = vld [vmem:[#allocation11 + $0x90] sm:$0xff]  ;;  %v1624_v50 = vld [vmem:[#allocation11 + $0x18] sm:$0xff] }
  0x54   : > { %452 = vmatpush.msra.mxu0 %v1501_v21  ;;  %525 = vmatpush.msra.mxu3 %v1490_v18  ;;  %v1626_v51 = vld [vmem:[#allocation11 + $0x88] sm:$0xff]  ;;  %v1632_v52 = vld [vmem:[#allocation11 + $0x10] sm:$0xff]  ;;  %v1634_v53 = vld [vmem:[#allocation11 + $0x80] sm:$0xff] }
  0x55   : > { %472 = vmatpush.msra.mxu1 %v1520_v27  ;;  %493 = vmatpush.msra.mxu2 %v1525_v29  ;;  %v1636_v54 = vld [vmem:[#allocation3] sm:$0x3]  ;;  %v1645_v56 = vld [vmem:[#allocation11] sm:$0xff]  ;;  %v444_v57 = vld [vmem:[%s1425_s28] sm:$0x3] }
  0x56   : > { %453 = vmatpush.msra.mxu0 %v1512_v25  ;;  %526 = vmatpush.msra.mxu3 %v1501_v21  ;;  %v1638_v55 = vld [vmem:[#allocation11 + $0x8] sm:$0xff] }
  0x57   : > { %473 = vmatpush.msra.mxu1 %v1529_v30  ;;  %494 = vmatpush.msra.mxu2 %v1534_v32 }
  0x58   : > { %454 = vmatpush.msra.mxu0 %v1522_v28  ;;  %527 = vmatpush.msra.mxu3 %v1512_v25 }
  0x59   : > { %474 = vmatpush.msra.mxu1 %v1539_v33  ;;  %495 = vmatpush.msra.mxu2 %v1544_v35 }
  0x5a   : > { %455 = vmatpush.msra.mxu0 %v1531_v31  ;;  %528 = vmatpush.msra.mxu3 %v1522_v28 }
  0x5b   : > { %475 = vmatpush.msra.mxu1 %v1549_v36  ;;  %496 = vmatpush.msra.mxu2 %v1554_v38 }
  0x5c   : > { %456 = vmatpush.msra.mxu0 %v1541_v34  ;;  %529 = vmatpush.msra.mxu3 %v1531_v31 }
  0x5d   : > { %476 = vmatpush.msra.mxu1 %v1559_v39  ;;  %497 = vmatpush.msra.mxu2 %v1564_v41 }
  0x5e   : > { %457 = vmatpush.msra.mxu0 %v1551_v37  ;;  %530 = vmatpush.msra.mxu3 %v1541_v34 }
  0x5f   : > { %477 = vmatpush.msra.mxu1 %v1569_v42  ;;  %498 = vmatpush.msra.mxu2 %v1574_v44 }
  0x60   : > { %458 = vmatpush.msra.mxu0 %v1561_v40  ;;  %531 = vmatpush.msra.mxu3 %v1551_v37 }
  0x61   : > { %499 = vmatpush.msra.mxu2 %v1582_v46  ;;  %478 = vmatpush.msra.mxu1 %v1618_v48 }
  0x62   : > { %459 = vmatpush.msra.mxu0 %v1571_v43  ;;  %532 = vmatpush.msra.mxu3 %v1561_v40 }
  0x63   : > { %500 = vmatpush.msra.mxu2 %v1620_v49  ;;  %479 = vmatpush.msra.mxu1 %v1624_v50 }
  0x64   : > { %460 = vmatpush.msra.mxu0 %v1579_v45  ;;  %533 = vmatpush.msra.mxu3 %v1571_v43 }
  0x65   : > { %461 = vmatmul.f32.vlgmr.msra.gmra.mxu0 %v1586_v47  ;;  %501 = vmatpush.msra.mxu2 %v1626_v51 }
  0x66   : > { %541 = vmatpush.msrb.mxu0 %v1473_v11  ;;  %534 = vmatpush.msra.mxu3 %v1579_v45 }
  0x67   : > { %480 = vmatpush.msra.mxu1 %v1632_v52  ;;  %502 = vmatpush.msra.mxu2 %v1634_v53 }
  0x68   : > { %542 = vmatpush.msrb.mxu0 %v1479_v14  ;;  %616 = vmatpush.msrb.mxu3 %v1473_v11 }
  0x69   : > { %503 = vmatmul.f32.vlgmr.msra.gmra.mxu2 %v1636_v54  ;;  %481 = vmatpush.msra.mxu1 %v1638_v55 }
  0x6a   : > { %543 = vmatpush.msrb.mxu0 %v1488_v17  ;;  %617 = vmatpush.msrb.mxu3 %v1479_v14 }
  0x6b   : > { %594 = vmatpush.msrb.mxu2 %v1444_v1  ;;  %482 = vmatpush.msra.mxu1 %v1645_v56 }
  0x6c   : > { %544 = vmatpush.msrb.mxu0 %v1499_v20  ;;  %618 = vmatpush.msrb.mxu3 %v1488_v17 }
  0x6d   : > { %595 = vmatpush.msrb.mxu2 %v1446_v2  ;;  %561 = vmatpush.msrb.mxu1 %v1469_v9 }
  0x6e   : > { %545 = vmatpush.msrb.mxu0 %v1510_v24  ;;  %619 = vmatpush.msrb.mxu3 %v1499_v20 }
  0x6f   : > { %596 = vmatpush.msrb.mxu2 %v1450_v4  ;;  %562 = vmatpush.msrb.mxu1 %v1471_v10 }
  0x70   : > { %546 = vmatpush.msrb.mxu0 %v1520_v27  ;;  %620 = vmatpush.msrb.mxu3 %v1510_v24 }
  0x71   : > { %597 = vmatpush.msrb.mxu2 %v1456_v6  ;;  %563 = vmatpush.msrb.mxu1 %v1484_v16 }
  0x72   : > { %547 = vmatpush.msrb.mxu0 %v1529_v30  ;;  %621 = vmatpush.msrb.mxu3 %v1520_v27 }
  0x73   : > { %598 = vmatpush.msrb.mxu2 %v1461_v7  ;;  %564 = vmatpush.msrb.mxu1 %v1494_v19 }
  0x74   : > { %548 = vmatpush.msrb.mxu0 %v1539_v33  ;;  %622 = vmatpush.msrb.mxu3 %v1529_v30 }
  0x75   : > { %599 = vmatpush.msrb.mxu2 %v1481_v15  ;;  %565 = vmatpush.msrb.mxu1 %v1504_v22 }
  0x76   : > { %549 = vmatpush.msrb.mxu0 %v1549_v36  ;;  %623 = vmatpush.msrb.mxu3 %v1539_v33 }
  0x77   : > { %600 = vmatpush.msrb.mxu2 %v1490_v18  ;;  %566 = vmatpush.msrb.mxu1 %v1515_v26 }
  0x78   : > { %550 = vmatpush.msrb.mxu0 %v1559_v39  ;;  %624 = vmatpush.msrb.mxu3 %v1549_v36 }
  0x79   : > { %601 = vmatpush.msrb.mxu2 %v1501_v21  ;;  %567 = vmatpush.msrb.mxu1 %v1525_v29 }
  0x7a   : > { %551 = vmatpush.msrb.mxu0 %v1569_v42  ;;  %625 = vmatpush.msrb.mxu3 %v1559_v39 }
  0x7b   : > { %602 = vmatpush.msrb.mxu2 %v1512_v25  ;;  %568 = vmatpush.msrb.mxu1 %v1534_v32 }
  0x7c   : > { %626 = vmatpush.msrb.mxu3 %v1569_v42  ;;  %552 = vmatpush.msrb.mxu0 %v1618_v48 }
  0x7d   : > { %603 = vmatpush.msrb.mxu2 %v1522_v28  ;;  %569 = vmatpush.msrb.mxu1 %v1544_v35 }
  0x7e   : > { %627 = vmatpush.msrb.mxu3 %v1618_v48  ;;  %553 = vmatpush.msrb.mxu0 %v1624_v50 }
  0x7f   : > { %604 = vmatpush.msrb.mxu2 %v1531_v31  ;;  %570 = vmatpush.msrb.mxu1 %v1554_v38 }
  0x80   : > { %628 = vmatpush.msrb.mxu3 %v1624_v50  ;;  %554 = vmatpush.msrb.mxu0 %v1632_v52 }
  0x81   : > { %605 = vmatpush.msrb.mxu2 %v1541_v34  ;;  %571 = vmatpush.msrb.mxu1 %v1564_v41 }
  0x82   : > { %555 = vmatpush.msrb.mxu0 %v1638_v55  ;;  %629 = vmatpush.msrb.mxu3 %v1632_v52 }
  0x83   : > { %606 = vmatpush.msrb.mxu2 %v1551_v37  ;;  %572 = vmatpush.msrb.mxu1 %v1574_v44 }
  0x84   : > { %556 = vmatpush.msrb.mxu0 %v1645_v56  ;;  %630 = vmatpush.msrb.mxu3 %v1638_v55 }
  0x85   : > { %607 = vmatpush.msrb.mxu2 %v1561_v40  ;;  %573 = vmatpush.msrb.mxu1 %v1582_v46 }
  0x86   : > { %636 = vmatpush.msra.mxu0 %v1469_v9  ;;  %631 = vmatpush.msrb.mxu3 %v1645_v56 }
  0x87   : > { %608 = vmatpush.msrb.mxu2 %v1571_v43  ;;  %574 = vmatpush.msrb.mxu1 %v1620_v49 }
  0x88   : > { %637 = vmatpush.msra.mxu0 %v1471_v10  ;;  %662 = vperm.xlu1 %1036, %v660_v0  }
  0x89   : > { %609 = vmatpush.msrb.mxu2 %v1579_v45  ;;  %575 = vmatpush.msrb.mxu1 %v1626_v51 }
  0x8a   : > { %638 = vmatpush.msra.mxu0 %v1484_v16 }
  0x8b   : > { %691 = vmatpush.msra.mxu2 %v1473_v11  ;;  %576 = vmatpush.msrb.mxu1 %v1634_v53 }
  0x8c   : > { %639 = vmatpush.msra.mxu0 %v1494_v19 }
  0x8d   : > { %692 = vmatpush.msra.mxu2 %v1479_v14 }
  0x8e   : > { %640 = vmatpush.msra.mxu0 %v1504_v22 }
  0x8f   : > { %693 = vmatpush.msra.mxu2 %v1488_v17 }
  0x90   : > { %641 = vmatpush.msra.mxu0 %v1515_v26 }
  0x91   : > { %694 = vmatpush.msra.mxu2 %v1499_v20  ;;  %v928_v20 = vld [vmem:[%s1425_s28 + $0x4] sm:$0x3] }
  0x92   : > { %642 = vmatpush.msra.mxu0 %v1525_v29 }
  0x93   : > { %695 = vmatpush.msra.mxu2 %v1510_v24 }
  0x94   : > { %643 = vmatpush.msra.mxu0 %v1534_v32 }
  0x95   : > { %696 = vmatpush.msra.mxu2 %v1520_v27 }
  0x96   : > { %644 = vmatpush.msra.mxu0 %v1544_v35 }
  0x97   : > { %697 = vmatpush.msra.mxu2 %v1529_v30 }
  0x98   : > { %645 = vmatpush.msra.mxu0 %v1554_v38 }
  0x99   : > { %698 = vmatpush.msra.mxu2 %v1539_v33 }
  0x9a   : > { %646 = vmatpush.msra.mxu0 %v1564_v41 }
  0x9b   : > { %699 = vmatpush.msra.mxu2 %v1549_v36 }
  0x9c   : > { %647 = vmatpush.msra.mxu0 %v1574_v44 }
  0x9d   : > { %700 = vmatpush.msra.mxu2 %v1559_v39 }
  0x9e   : > { %648 = vmatpush.msra.mxu0 %v1582_v46 }
  0x9f   : > { %701 = vmatpush.msra.mxu2 %v1569_v42 }
  0xa0   : > { %649 = vmatpush.msra.mxu0 %v1620_v49 }
  0xa1   : > { %702 = vmatpush.msra.mxu2 %v1618_v48 }
  0xa2   : > { %650 = vmatpush.msra.mxu0 %v1626_v51 }
  0xa3   : > { %703 = vmatpush.msra.mxu2 %v1624_v50 }
  0xa4   : > { %651 = vmatpush.msra.mxu0 %v1634_v53 }
  0xa5   : > { %704 = vmatpush.msra.mxu2 %v1632_v52 }
  0xa7   : > { %705 = vmatpush.msra.mxu2 %v1638_v55 }
  0xa9   : > { %706 = vmatpush.msra.mxu2 %v1645_v56 }
  0xbb   : > { %v1700_v60 = vpop.permute.xlu0 %512 }
  0xbc   : > { %vm514_vm2 = vcmp.eq.s32.totalorder %v1700_v60, 1 }
  0xe2   : > { %v462_v58 = vpop.f32.mrf.mxu0 }
  0xe3   : > { %v465_v59 = vadd.f32 %v462_v58, %v444_v57 }
  0xe5   : > { %1038 = vtanh.f32 %v465_v59 }
  0xeb   : > { %v1039_v61 = vpop.eup %1038 }
  0xec   : > { %483 = vmatmul.f32.vlgmr.msra.gmra.mxu1 %v1039_v61  ;;  %v1712_v62 = vsel %vm514_vm2, %v1039_v61, %v1586_v47 }
  0xed   : > { %535 = vmatmul.f32.vlgmr.msra.gmra.mxu3 %v1712_v62  ;;  %669 = vmatpush.msra.mxu1 %v1444_v1  ;;  %v733_v1 = vstv %s732_s23 }
  0xee   : > { %711 = vmatpush.msra.mxu3 %v1469_v9  ;;  %vm734_vm4 = vcmp.lt.s32.totalorder %v733_v1, %v1466_v8  ;;  %v588_v8 = vpop.permute.xlu0 %587 }
  0xef   : > { %670 = vmatpush.msra.mxu1 %v1446_v2  ;;  %v735_v2 = vsel %vm734_vm4, 1, %v1275_v3  ;;  %vm589_vm5 = vcmp.eq.s32.totalorder %v588_v8, 1 }
  0xf0   : > { %712 = vmatpush.msra.mxu3 %v1471_v10  ;;  %737 = vperm.xlu1 %1036, %v735_v2   ;;  %v927_v10 = vld [vmem:[%s1425_s28 + $0x2] sm:$0x3] }
  0xf1   : > { %671 = vmatpush.msra.mxu1 %v1450_v4  ;;  %v1037_v4 = vld [vmem:[%s1811_s5] ss:$0 sm:$0xff] }
  0xf2   : > { %713 = vmatpush.msra.mxu3 %v1484_v16 }
  0xf3   : > { %672 = vmatpush.msra.mxu1 %v1456_v6  ;;  %v504_v6 = vpop.f32.mrf.mxu2 }
  0xf4   : > { %714 = vmatpush.msra.mxu3 %v1494_v19 }
  0xf5   : > { %673 = vmatpush.msra.mxu1 %v1461_v7 }
  0xf6   : > { %715 = vmatpush.msra.mxu3 %v1504_v22 }
  0xf7   : > { %674 = vmatpush.msra.mxu1 %v1481_v15 }
  0xf8   : > { %716 = vmatpush.msra.mxu3 %v1515_v26 }
  0xf9   : > { %675 = vmatpush.msra.mxu1 %v1490_v18 }
  0xfa   : > { %717 = vmatpush.msra.mxu3 %v1525_v29 }
  0xfb   : > { %676 = vmatpush.msra.mxu1 %v1501_v21 }
  0xfc   : > { %718 = vmatpush.msra.mxu3 %v1534_v32 }
  0xfd   : > { %677 = vmatpush.msra.mxu1 %v1512_v25  ;;  %v663_v25 = vpop.permute.xlu1 %662 }
  0xfe   : > { %719 = vmatpush.msra.mxu3 %v1544_v35  ;;  %vm664_vm6 = vcmp.eq.s32.totalorder %v663_v25, 1 }
  0xff   : > { %678 = vmatpush.msra.mxu1 %v1522_v28  ;;  %v929_v28 = vld [vmem:[%s1425_s28 + $0x6] sm:$0x3] }
 0x100   : > { %720 = vmatpush.msra.mxu3 %v1554_v38 }
 0x101   : > { %679 = vmatpush.msra.mxu1 %v1531_v31 }
 0x102   : > { %721 = vmatpush.msra.mxu3 %v1564_v41 }
 0x103   : > { %680 = vmatpush.msra.mxu1 %v1541_v34 }
 0x104   : > { %722 = vmatpush.msra.mxu3 %v1574_v44 }
 0x105   : > { %681 = vmatpush.msra.mxu1 %v1551_v37 }
 0x106   : > { %723 = vmatpush.msra.mxu3 %v1582_v46 }
 0x107   : > { %682 = vmatpush.msra.mxu1 %v1561_v40 }
 0x108   : > { %724 = vmatpush.msra.mxu3 %v1620_v49 }
 0x109   : > { %683 = vmatpush.msra.mxu1 %v1571_v43 }
 0x10a   : > { %725 = vmatpush.msra.mxu3 %v1626_v51 }
 0x10b   : > { %684 = vmatpush.msra.mxu1 %v1579_v45 }
 0x10c   : > { %726 = vmatpush.msra.mxu3 %v1634_v53 }
 0x162   : > { %v738_v32 = vpop.permute.xlu1 %737 }
 0x163   : > { %vm739_vm7 = vcmp.eq.s32.totalorder %v738_v32, 1 }
 0x169   : > { %v484_v5 = vpop.f32.mrf.mxu1 }
 0x16a   : > { %v485_v7 = vadd.f32 %v1037_v4, %v484_v5 }
 0x16c   : > { %v505_v9 = vadd.f32 %v504_v6, %v485_v7 }
 0x16e   : > { %1040 = vtanh.f32 %v505_v9 }
 0x170   : > { %v536_v11 = vpop.f32.mrf.mxu3 }
 0x171   : > { %v539_v12 = vadd.f32 %v927_v10, %v536_v11 }
 0x173   : > { %1042 = vtanh.f32 %v539_v12 }
 0x174   : > { %v1041_v13 = vpop.eup %1040 }
 0x175   : > { %v516_v3 = vsel %vm514_vm2, %v1041_v13, %v1636_v54 }
 0x176   : > { %577 = vmatmul.f32.vlgmr.msrb.gmra.mxu1 %v516_v3 }
 0x179   : > { %v1043_v14 = vpop.eup %1042 }
 0x17a   : > { %557 = vmatmul.f32.vlgmr.msrb.gmra.mxu0 %v1043_v14  ;;  %v590_v15 = vsel %vm589_vm5, %v1043_v14, %v1712_v62 }
 0x17b   : > { %610 = vmatmul.f32.vlgmr.msrb.gmra.mxu2 %v590_v15 }
 0x1f3   : > { %v578_v18 = vpop.f32.mrf.mxu1 }
 0x1f7   : > { %v558_v16 = vpop.f32.mrf.mxu0 }
 0x1f8   : > { %v559_v17 = vadd.f32 %v1037_v4, %v558_v16 }
 0x1fa   : > { %v579_v19 = vadd.f32 %v578_v18, %v559_v17 }
 0x1fc   : > { %1044 = vtanh.f32 %v579_v19 }
 0x1fe   : > { %v611_v21 = vpop.f32.mrf.mxu2 }
 0x1ff   : > { %v614_v22 = vadd.f32 %v928_v20, %v611_v21 }
 0x201   : > { %1046 = vtanh.f32 %v614_v22 }
 0x202   : > { %v1045_v23 = vpop.eup %1044 }
 0x203   : > { %v591_v24 = vsel %vm589_vm5, %v1045_v23, %v516_v3 }
 0x204   : > { %652 = vmatmul.f32.vlgmr.msra.gmra.mxu0 %v591_v24 }
 0x207   : > { %v1047_v26 = vpop.eup %1046 }
 0x208   : > { %v665_v27 = vsel %vm664_vm6, %v1047_v26, %v590_v15  ;;  %632 = vmatmul.f32.vlgmr.msrb.gmra.mxu3 %v1047_v26 }
 0x209   : > { %685 = vmatmul.f32.vlgmr.msra.gmra.mxu1 %v665_v27 }
 0x281   : > { %v653_v34 = vpop.f32.mrf.mxu0 }
 0x286   : > { %v686_v29 = vpop.f32.mrf.mxu1 }
 0x287   : > { %v689_v30 = vadd.f32 %v929_v28, %v686_v29 }
 0x289   : > { %1048 = vtanh.f32 %v689_v30 }
 0x28b   : > { %v633_v31 = vpop.f32.mrf.mxu3 }
 0x28c   : > { %v634_v33 = vadd.f32 %v1037_v4, %v633_v31 }
 0x28e   : > { %v654_v35 = vadd.f32 %v653_v34, %v634_v33 }
 0x28f   : > { %v1049_v36 = vpop.eup %1048 }
 0x290   : > { %v740_v37 = vsel %vm739_vm7, %v1049_v36, %v665_v27  ;;  %1050 = vtanh.f32 %v654_v35  ;;  %707 = vmatmul.f32.vlgmr.msra.gmra.mxu2 %v1049_v36 }
 0x291   : > { %742 = vst [vmem:[#allocation2] sm:$0x3] %v740_v37 }
 0x296   : > { %v1051_v38 = vpop.eup %1050 }
 0x297   : > { %v666_v39 = vsel %vm664_vm6, %v1051_v38, %v591_v24 }
 0x298   : > { %727 = vmatmul.f32.vlgmr.msra.gmra.mxu3 %v666_v39 }
 0x313   : > { %v708_v40 = vpop.f32.mrf.mxu2 }
 0x314   : > { %v709_v41 = vadd.f32 %v1037_v4, %v708_v40 }
 0x31b   : > { %v728_v42 = vpop.f32.mrf.mxu3 }
 0x31c   : > { %v729_v43 = vadd.f32 %v728_v42, %v709_v41 }
 0x31e   : > { %1052 = vtanh.f32 %v729_v43 }
 0x324   : > { %v1053_v44 = vpop.eup %1052 }
 0x325   : > { %v741_v45 = vsel %vm739_vm7, %v1053_v44, %v666_v39 }
 0x326   : > { %743 = vst [vmem:[#allocation3] sm:$0x3] %v741_v45 }
 0x327 PF: > { %p930_p1 = scmp.ne.s32.totalorder %s1257_s10, 1 }
 0x329   : > { %747 = sbr.rel (%p930_p1) target bundleno = 977 (0x3d1), region = 76 }
 0x32e   : > { %v764_v46 = vld [vmem:[#allocation12 + $0x78] sm:$0xff]  ;;  %v763_v47 = vld [vmem:[#allocation12 + $0x70] sm:$0xff]  ;;  %v762_v48 = vld [vmem:[#allocation12 + $0x68] sm:$0xff] }
 0x32f   : > { %769 = vmatpush.msra.mxu0 %v764_v46  ;;  %v761_v49 = vld [vmem:[#allocation12 + $0x60] sm:$0xff]  ;;  %v760_v50 = vld [vmem:[#allocation12 + $0x58] sm:$0xff]  ;;  %v759_v51 = vld [vmem:[#allocation12 + $0x50] sm:$0xff] }
 0x330   : > { %v758_v52 = vld [vmem:[#allocation12 + $0x48] sm:$0xff]  ;;  %v757_v53 = vld [vmem:[#allocation12 + $0x40] sm:$0xff]  ;;  %v756_v54 = vld [vmem:[#allocation12 + $0x38] sm:$0xff] }
 0x331   : > { %770 = vmatpush.msra.mxu0 %v763_v47  ;;  %v755_v55 = vld [vmem:[#allocation12 + $0x30] sm:$0xff]  ;;  %v754_v56 = vld [vmem:[#allocation12 + $0x28] sm:$0xff]  ;;  %v753_v57 = vld [vmem:[#allocation12 + $0x20] sm:$0xff] }
 0x332   : > { %v752_v58 = vld [vmem:[#allocation12 + $0x18] sm:$0xff]  ;;  %v751_v59 = vld [vmem:[#allocation12 + $0x10] sm:$0xff]  ;;  %v750_v60 = vld [vmem:[#allocation12 + $0x8] sm:$0xff] }
 0x333   : > { %771 = vmatpush.msra.mxu0 %v762_v48  ;;  %v749_v61 = vld [vmem:[#allocation12] sm:$0xff]  ;;  %v748_v62 = vld [vmem:[#allocation2] sm:$0x3] }
 0x334   : > { %v1054_v63 = vld [vmem:[%s1813_s7] ss:$0 sm:$0xff] }
 0x335   : > { %772 = vmatpush.msra.mxu0 %v761_v49 }
 0x337   : > { %773 = vmatpush.msra.mxu0 %v760_v50 }
 0x339   : > { %774 = vmatpush.msra.mxu0 %v759_v51 }
 0x33b   : > { %775 = vmatpush.msra.mxu0 %v758_v52 }
 0x33d   : > { %776 = vmatpush.msra.mxu0 %v757_v53 }
 0x33f   : > { %777 = vmatpush.msra.mxu0 %v756_v54 }
 0x341   : > { %778 = vmatpush.msra.mxu0 %v755_v55 }
 0x343   : > { %779 = vmatpush.msra.mxu0 %v754_v56 }
 0x345   : > { %780 = vmatpush.msra.mxu0 %v753_v57 }
 0x347   : > { %781 = vmatpush.msra.mxu0 %v752_v58 }
 0x349   : > { %782 = vmatpush.msra.mxu0 %v751_v59 }
 0x34b   : > { %783 = vmatpush.msra.mxu0 %v750_v60 }
 0x34d   : > { %784 = vmatpush.msra.mxu0 %v749_v61 }
 0x34e   : > { %785 = vmatmul.f32.vlgmr.msra.gmra.mxu0 %v748_v62 }
 0x3cb   : > { %v786_v0 = vpop.f32.mrf.mxu0 }
 0x3cc   : > { %v787_v1 = vadd.f32 %v1054_v63, %v786_v0 }
 0x3ce   : > { %v789_v2 = vmax.f32 %v787_v1, 0.0 }
 0x3d0   : > { %790 = vst [vmem:[#allocation14] sm:$0x3] %v789_v2 }
 0x3d1 PF: > { %s1825_s15 = sadd.s32 4294967295, %s1265_s12   ;;  %s801_s22 = sshll.u32 %s1814_s8, 4  ;;  %s802_s22 = int_to_ptr.hbm [resolvable:$true] %s801_s22 }
 0x3d2   : > { %p975_p4 = scmp.eq.s32.totalorder %s1825_s15, 1  ;;  %s1276_s20 = smov [#allocation14]  }
 0x3d3   : > { %s799_s24 = sshll.u32 %s1276_s20, 4  ;;  %s800_s24 = int_to_ptr.vmem [resolvable:$true] %s799_s24 }
 0x3d4   : > { %951 = dma.vmem_to_hbm [thread:$0]  (%p975_p4), %s800_s24, 32, %s802_s22, [#allocation8]  }
 0x3d5   : > { %1240 = dma.done.wait (%p975_p4), [#allocation8], 32  }
 0x3d6   : > { %1242 = vsyncadd (%p975_p4), [#allocation8], 4294967264 }
 0x3d7 PF: > { %s25_s12 = sadd.s32 1, %s1265_s12   ;;  %s1826_s29 = smov %s1249_s30 }
 0x3d8   : > { %p22_p5 = scmp.ge.s32.totalorder %s25_s12, 4   ;;  %s1827_s30 = smov %s1253_s9 }
 0x3d9   : > { %s1828_s9 = smov %s1413_s26  ;;  %s1829_s10 = smov %s1261_s11 }
 0x3da   : > { %s1830_s11 = smov %s1832_s17  ;;  %24 = sbr.rel (!%p22_p5) target bundleno = 11 (0xb), region = 116 }
 0x3df   :  { %815 = vsyncpa [#allocation7], 1 }
 0x3e0   :  { %817 = vsyncpa [#allocation7 + $0x1], 1 }
 0x3e1   :  { %818 = vsyncpa [#allocation10], 1 }
 0x3e2   :  { %819 = vsyncpa [#allocation13], 1 }
 0x3e3   :  { %820 = vsyncpa [#allocation8], 1 }
 0x3e4   :  { %822 = vsyncpa [#allocation8 + $0x1], 1 }

</bundles_post_ra>
